<compile_context>
chip_gen: v5e
topology: v5e:2x2
jax: 0.10.0
libtpu: 0.0.40
codegen_flags: <defaults>
</compile_context>

<pallas_src>
import functools
import math

import jax
import jax.numpy as jnp
from jax import lax
from jax.experimental import pallas as pl
from jax.experimental.pallas import tpu as pltpu


def _mhdpa_attention_kernel(augx_ref, wq_ref, wk_ref, wv_ref, o_ref, *, scale):
    """Per-batch fused: q/k/v projection -> scaled scores -> softmax(dim=0) -> A @ v."""
    xb = augx_ref[0]                                                      # (F, Cin)
    q = jnp.dot(xb, wq_ref[...], preferred_element_type=jnp.float32)      # (F, I)
    k = jnp.dot(xb, wk_ref[...], preferred_element_type=jnp.float32)      # (F, I)
    v = jnp.dot(xb, wv_ref[...], preferred_element_type=jnp.float32)      # (F, I)

    # scores[i, j] = q_i . k_j, scaled by 1/sqrt(I)   (MXU)
    s = jnp.dot(q, k.T, preferred_element_type=jnp.float32) * scale       # (F, F)

    # softmax over axis 0 (query axis), exactly F.softmax(..., dim=0)
    m = jnp.max(s, axis=0, keepdims=True)
    e = jnp.exp(s - m)
    z = jnp.sum(e, axis=0, keepdims=True)
    a = e / z

    # TODO(synk): output last dim I=64 (<128 lanes) -> masked stores; acceptable at this size.
    o_ref[0] = jnp.dot(a, v, preferred_element_type=jnp.float32)          # (F, I)


def mhdpa_relation_forward(x, wq_t, wk_t, wv_t, *, interactions_dim):
    """x: (B, C, H, W) float32; w*_t: (C + 2, interactions_dim) == nn.Linear.weight.T.

    Returns (B, H*W, interactions_dim), matching MHDPARelationModule.forward.
    """
    B, C, H, W = x.shape
    F = H * W
    Cin = C + 2
    assert wq_t.shape == (Cin, interactions_dim), wq_t.shape

    # addXYfeatures: x-coord varies along H (dim 2), y-coord along W (dim 3);
    # value at index i is -1 + (i + 0.5) * (2 / size).  Constant-folded at compile time.
    fx = (jnp.arange(H, dtype=jnp.float32) + 0.5) * (2.0 / H) - 1.0
    fy = (jnp.arange(W, dtype=jnp.float32) + 0.5) * (2.0 / W) - 1.0
    coord = jnp.stack(
        [jnp.broadcast_to(fx[:, None], (H, W)),
         jnp.broadcast_to(fy[None, :], (H, W))], axis=-1).reshape(F, 2)

    # Entity-major layout (B, F, Cin); this is the only wrapper-side glue.
    xe = jnp.transpose(x, (0, 2, 3, 1)).reshape(B, F, C)
    augx = jnp.concatenate(
        [xe, jnp.broadcast_to(coord[None], (B, F, 2))], axis=-1)          # (B, F, Cin)

    kernel = functools.partial(_mhdpa_attention_kernel,
                               scale=1.0 / math.sqrt(interactions_dim))
    return pl.pallas_call(
        kernel,
        out_shape=jax.ShapeDtypeStruct((B, F, interactions_dim), jnp.float32),
        grid=(B,),
        in_specs=[
            pl.BlockSpec((1, F, Cin), lambda b: (b, 0, 0)),
            pl.BlockSpec((Cin, interactions_dim), lambda b: (0, 0)),
            pl.BlockSpec((Cin, interactions_dim), lambda b: (0, 0)),
            pl.BlockSpec((Cin, interactions_dim), lambda b: (0, 0)),
        ],
        out_specs=pl.BlockSpec((1, F, interactions_dim), lambda b: (b, 0, 0)),
        compiler_params=pltpu.CompilerParams(
            dimension_semantics=("parallel",)),   # batch axis -> 2 TCs on v7x, harmless elsewhere
    )(augx, wq_t, wk_t, wv_t)


def make_params(key, in_dim, interactions_dim):
    """Bias-free generator weights, stored pre-transposed as (in_dim, I) == weight.T
    (hoists the repack out of the traced forward, per the perf review)."""
    kq, kk, kv = jax.random.split(key, 3)
    bound = 1.0 / math.sqrt(in_dim)           # nn.Linear default init range
    shape = (in_dim, interactions_dim)
    wq_t = jax.random.uniform(kq, shape, jnp.float32, -bound, bound)
    wk_t = jax.random.uniform(kk, shape, jnp.float32, -bound, bound)
    wv_t = jax.random.uniform(kv, shape, jnp.float32, -bound, bound)
    return wq_t, wk_t, wv_t


def _reference(x, wq_t, wk_t, wv_t, interactions_dim):
    """Pure-JAX mirror of MHDPARelationModule.forward (addXYfeatures + applyMHDPA)."""
    B, C, H, W = x.shape
    F = H * W
    fx = (jnp.arange(H, dtype=jnp.float32) + 0.5) * (2.0 / H) - 1.0
    fy = (jnp.arange(W, dtype=jnp.float32) + 0.5) * (2.0 / W) - 1.0
    fxy = jnp.broadcast_to(fx[:, None], (H, W))
    fyx = jnp.broadcast_to(fy[None, :], (H, W))
    coords = jnp.stack([fxy, fyx], axis=0)                                # (2, H, W)
    aug = jnp.concatenate(
        [x, jnp.broadcast_to(coords[None], (B, 2, H, W))], axis=1)        # (B, C+2, H, W)
    aug = aug.reshape(B, C + 2, F)
    hi = lax.Precision.HIGHEST
    outs = []
    for b in range(B):
        xb = aug[b].T                                                     # (F, C+2)
        q = jnp.dot(xb, wq_t, precision=hi)
        k = jnp.dot(xb, wk_t, precision=hi)
        v = jnp.dot(xb, wv_t, precision=hi)
        s = jnp.dot(q, k.T, precision=hi) / jnp.sqrt(jnp.float32(interactions_dim))
        a = jax.nn.softmax(s, axis=0)
        outs.append(jnp.dot(a, v, precision=hi))
    return jnp.stack(outs, axis=0)


if __name__ == "__main__":
    key = jax.random.PRNGKey(0)
    k_x, k_p = jax.random.split(key)

    # Default module hyper-params: depth_dim=24, qst_dim=11, interactions_dim=64.
    # forward() only type-checks when x has depth_dim + qst_dim channels (question
    # pre-concatenated along channels), so C = 35 and the generator input is C + 2 = 37.
    B, H, W = 2, 8, 8
    depth_dim, qst_dim, interactions_dim = 24, 11, 64
    C = depth_dim + qst_dim

    x = jax.random.normal(k_x, (B, C, H, W), jnp.float32)
    wq_t, wk_t, wv_t = make_params(k_p, C + 2, interactions_dim)

    fwd = jax.jit(functools.partial(mhdpa_relation_forward,
                                    interactions_dim=interactions_dim))
    out = jax.block_until_ready(fwd(x, wq_t, wk_t, wv_t))
    assert out.shape == (B, H * W, interactions_dim), out.shape

    ref = _reference(x, wq_t, wk_t, wv_t, interactions_dim)
    err = float(jnp.max(jnp.abs(out - ref)))
    assert jnp.allclose(out, ref, atol=1e-3, rtol=1e-3), err

    print("KERNEL_OK")
</pallas_src>

<mosaic_0001>
module attributes {stable_mosaic.version = 11 : i64} {
  func.func @_mhdpa_attention_kernel(%arg0: i32, %arg1: memref<1x64x37xf32, #tpu.memory_space<vmem>>, %arg2: memref<37x64xf32, #tpu.memory_space<vmem>>, %arg3: memref<37x64xf32, #tpu.memory_space<vmem>>, %arg4: memref<37x64xf32, #tpu.memory_space<vmem>>, %arg5: memref<1x64x64xf32, #tpu.memory_space<vmem>>) attributes {dimension_semantics = [#tpu.dimension_semantics<parallel>], iteration_bounds = array<i64: 2>, scalar_prefetch = 0 : i64, scratch_operands = 0 : i64, tpu.core_type = #tpu.core_type<tc>, window_params = [{transform_indices = @transform_0, window_bounds = array<i64: 1, 64, 37>}, {pipeline_mode = #tpu.pipeline_mode<synchronous>, transform_indices = @transform_1, window_bounds = array<i64: 37, 64>}, {pipeline_mode = #tpu.pipeline_mode<synchronous>, transform_indices = @transform_2, window_bounds = array<i64: 37, 64>}, {pipeline_mode = #tpu.pipeline_mode<synchronous>, transform_indices = @transform_3, window_bounds = array<i64: 37, 64>}, {transform_indices = @transform_4, window_bounds = array<i64: 1, 64, 64>}]} {
    %c0 = arith.constant 0 : index
    %c0_0 = arith.constant 0 : index
    %c0_1 = arith.constant 0 : index
    %0 = vector.load %arg1[%c0, %c0_0, %c0_1] : memref<1x64x37xf32, #tpu.memory_space<vmem>>, vector<1x64x37xf32>
    %1 = vector.shape_cast %0 : vector<1x64x37xf32> to vector<64x37xf32>
    %c0_2 = arith.constant 0 : index
    %c0_3 = arith.constant 0 : index
    %2 = vector.load %arg2[%c0_2, %c0_3] : memref<37x64xf32, #tpu.memory_space<vmem>>, vector<37x64xf32>
    %cst = arith.constant dense<0.000000e+00> : vector<64x64xf32>
    %3 = tpu.matmul %1, %2, %cst {dimension_numbers = #tpu.dot_dimension_numbers<[1], [0], [0], [1], [0, 0, 1, 1], [], []>} : vector<64x37xf32>, vector<37x64xf32>, vector<64x64xf32> -> vector<64x64xf32>
    %c0_4 = arith.constant 0 : index
    %c0_5 = arith.constant 0 : index
    %4 = vector.load %arg3[%c0_4, %c0_5] : memref<37x64xf32, #tpu.memory_space<vmem>>, vector<37x64xf32>
    %cst_6 = arith.constant dense<0.000000e+00> : vector<64x64xf32>
    %5 = tpu.matmul %1, %4, %cst_6 {dimension_numbers = #tpu.dot_dimension_numbers<[1], [0], [0], [1], [0, 0, 1, 1], [], []>} : vector<64x37xf32>, vector<37x64xf32>, vector<64x64xf32> -> vector<64x64xf32>
    %c0_7 = arith.constant 0 : index
    %c0_8 = arith.constant 0 : index
    %6 = vector.load %arg4[%c0_7, %c0_8] : memref<37x64xf32, #tpu.memory_space<vmem>>, vector<37x64xf32>
    %cst_9 = arith.constant dense<0.000000e+00> : vector<64x64xf32>
    %7 = tpu.matmul %1, %6, %cst_9 {dimension_numbers = #tpu.dot_dimension_numbers<[1], [0], [0], [1], [0, 0, 1, 1], [], []>} : vector<64x37xf32>, vector<37x64xf32>, vector<64x64xf32> -> vector<64x64xf32>
    %8 = tpu.transpose %5, [1, 0] : vector<64x64xf32> -> vector<64x64xf32>
    %cst_10 = arith.constant dense<0.000000e+00> : vector<64x64xf32>
    %9 = tpu.matmul %3, %8, %cst_10 {dimension_numbers = #tpu.dot_dimension_numbers<[1], [0], [0], [1], [0, 0, 1, 1], [], []>} : vector<64x64xf32>, vector<64x64xf32>, vector<64x64xf32> -> vector<64x64xf32>
    %cst_11 = arith.constant 1.250000e-01 : f32
    %10 = vector.broadcast %cst_11 : f32 to vector<64x64xf32>
    %11 = arith.mulf %9, %10 : vector<64x64xf32>
    %cst_12 = arith.constant dense<0xFF800000> : vector<64xf32>
    %12 = vector.multi_reduction <maximumf>, %11, %cst_12 [0] : vector<64x64xf32> to vector<64xf32>
    %13 = vector.shape_cast %12 : vector<64xf32> to vector<1x64xf32>
    %14 = vector.broadcast %13 : vector<1x64xf32> to vector<64x64xf32>
    %15 = arith.subf %11, %14 : vector<64x64xf32>
    %16 = math.exp %15 : vector<64x64xf32>
    %cst_13 = arith.constant dense<0.000000e+00> : vector<64xf32>
    %17 = vector.multi_reduction <add>, %16, %cst_13 [0] : vector<64x64xf32> to vector<64xf32>
    %18 = vector.shape_cast %17 : vector<64xf32> to vector<1x64xf32>
    %19 = vector.broadcast %18 : vector<1x64xf32> to vector<64x64xf32>
    %20 = arith.divf %16, %19 : vector<64x64xf32>
    %cst_14 = arith.constant dense<0.000000e+00> : vector<64x64xf32>
    %21 = tpu.matmul %20, %7, %cst_14 {dimension_numbers = #tpu.dot_dimension_numbers<[1], [0], [0], [1], [0, 0, 1, 1], [], []>} : vector<64x64xf32>, vector<64x64xf32>, vector<64x64xf32> -> vector<64x64xf32>
    %c0_15 = arith.constant 0 : index
    %c0_16 = arith.constant 0 : index
    %c0_17 = arith.constant 0 : index
    %22 = vector.load %arg5[%c0_15, %c0_16, %c0_17] : memref<1x64x64xf32, #tpu.memory_space<vmem>>, vector<1x64x64xf32>
    %23 = vector.shape_cast %22 : vector<1x64x64xf32> to vector<64x64xf32>
    %24 = vector.shape_cast %21 : vector<64x64xf32> to vector<1x64x64xf32>
    tpu.vector_store %arg5[%c0_15, %c0_16, %c0_17], %24 {strides = array<i32>} : memref<1x64x64xf32, #tpu.memory_space<vmem>>, vector<1x64x64xf32>,
    return
  }
  func.func @transform_0(%arg0: i32) -> (i32, i32, i32) {
    %c0_i32 = arith.constant 0 : i32
    %c0_i32_0 = arith.constant 0 : i32
    %c0_i32_1 = arith.constant 0 : i32
    return %arg0, %c0_i32, %c0_i32_0 : i32, i32, i32
  }
  func.func @transform_1(%arg0: i32) -> (i32, i32) {
    %c0_i32 = arith.constant 0 : i32
    %c0_i32_0 = arith.constant 0 : i32
    %c0_i32_1 = arith.constant 0 : i32
    return %c0_i32, %c0_i32_0 : i32, i32
  }
  func.func @transform_2(%arg0: i32) -> (i32, i32) {
    %c0_i32 = arith.constant 0 : i32
    %c0_i32_0 = arith.constant 0 : i32
    %c0_i32_1 = arith.constant 0 : i32
    return %c0_i32, %c0_i32_0 : i32, i32
  }
  func.func @transform_3(%arg0: i32) -> (i32, i32) {
    %c0_i32 = arith.constant 0 : i32
    %c0_i32_0 = arith.constant 0 : i32
    %c0_i32_1 = arith.constant 0 : i32
    return %c0_i32, %c0_i32_0 : i32, i32
  }
  func.func @transform_4(%arg0: i32) -> (i32, i32, i32) {
    %c0_i32 = arith.constant 0 : i32
    %c0_i32_0 = arith.constant 0 : i32
    %c0_i32_1 = arith.constant 0 : i32
    return %arg0, %c0_i32, %c0_i32_0 : i32, i32, i32
  }
}

</mosaic_0001>

<bundles_post_ra>
// kernel: mhdpa_relation_forward.1
= control target key start
LH: loop header
LB: loop body
LE: loop exit
PB: predicated region body
PF: predicated region fallthrough
CT: control target
= control target key end

     0   :  { %9 = vsyncpa [#allocation3], 0  ;;  %s1161_s0 = inlined_call_operand.vmem [shape: f32[2,64,37], index: 0, kind: input, shape index: {}]   ;;  %s1162_s1 = inlined_call_operand.vmem [shape: f32[37,64], index: 1, kind: input, shape index: {}]   ;;  %s1163_s2 = inlined_call_operand.vmem [shape: f32[37,64], index: 2, kind: input, shape index: {}]   ;;  %s1164_s3 = inlined_call_operand.vmem [shape: f32[37,64], index: 3, kind: input, shape index: {}]   ;;  %s1165_s4 = inlined_call_operand.hbm [shape: f32[2,64,64], index: 4, kind: output, shape index: {}]  }
   0x1   :  { %11 = vsyncpa [#allocation3 + $0x1], 0  ;;  %s939_s15 = smov 0   ;;  %s941_s16 = smov 0  }
   0x2   :  { %s943_s17 = smov 0   ;;  %s945_s18 = smov 0  }
   0x3 LB: > { %s960_s19 = sadd.s32 4294967295, %s910_s18   ;;  %s714_s20 = sadd.s32 4294967294, %s910_s18   ;;  %s910_s18 = sphi %s945_s18, %s1171_s18   ;;  %s906_s17 = sphi %s943_s17, %s1170_s17   ;;  %s902_s16 = sphi %s941_s16, %s1169_s16   ;;  %s898_s15 = sphi %s939_s15, %s1168_s15  }
   0x4   : > { %s964_s21 = sadd.s32 1, %s910_s18   ;;  %s113_s22 = sadd.s32 1, %s906_s17 }
   0x5   : > { %s110_s23 = ssub.s32 %s910_s18, %s964_s21  ;;  %p123_p0 = scmp.ne.s32.totalorder %s906_s17, %s902_s16 }
   0x6   : > { %p111_p1 = scmp.eq.s32.totalorder %s110_s23, 0  ;;  %p124_p2 = scmp.eq.s32.totalorder %s960_s19, 1 }
   0x7   : > { %p129_p3 = scmp.ne.s32.totalorder %s902_s16, %s898_s15  ;;  %p130_p4 = scmp.eq.s32.totalorder %s714_s20, 1 }
   0x8   : > { %s975_s24 = scalar_select %p111_p1, %s906_s17, %s113_s22  }
   0x9   : > { %p977_p5 = por %p124_p2, %p123_p0  ;;  %p981_p6 = por %p130_p4, %p129_p3 }
   0xa   : > { %p717_p7 = scmp.ge.s32.totalorder %s910_s18, 1  ;;  %p165_p8 = scmp.lt.s32.totalorder %s910_s18, 3 }
   0xc   : > { %p166_p9 = pnand %p717_p7, %p165_p8 }
   0xd   : > { %p191_p10 = scmp.lt.s32.totalorder (!%p166_p9), %s960_s19, 1  ;;  %s188_s28 = sand.u32 (!%p166_p9), 1, %s902_s16  }
   0xe   : > { %169 = sbr.rel (%p166_p9) target bundleno = 711 (0x2c7), region = 36  ;;  %s718_s29 = sshll.u32 (!%p166_p9), %s188_s28, 6 }
   0xf   : > { %s190_s30 = scalar_lea.vmem (!%p166_p9), [#allocation2], %s718_s29  ;;  %s778_s5 = sshll.u32 (!%p166_p9), %s960_s19, 6 }
  0x10   : > { %s648_s8 = scalar_lea.hbm (!%p166_p9), %s1165_s4, %s778_s5  ;;  %s649_s9 = sshll.u32 (!%p166_p9), %s190_s30, 4  ;;  %s650_s9 = int_to_ptr.vmem [resolvable:$true] %s649_s9 }
  0x11   : > { %s637_s11 = scalar_lea.sflag (!%p166_p9), [#allocation3], %s188_s28  ;;  %s868_s20 = scalar_lea.hbm (!%p166_p9), %s1165_s4, 128 }
  0x13   : > { %v208_v0 = vld [vmem:[%s1162_s1 + $0x20] sm:$0x1f]  ;;  %vm234_vm0 = vcmask 1044480   ;;  %v207_v1 = vld [vmem:[%s1162_s1 + $0x18] sm:$0xff]  ;;  %v206_v2 = vld [vmem:[%s1162_s1 + $0x10] sm:$0xff]  ;;  %s192_s7 = scalar_select %p191_p10, %s960_s19, 1 }
  0x14   : > { %779 = vmatpush.msk.msra.mxu1 %vm234_vm0, %v208_v0  ;;  %721 = vmatpush.msk.msra.mxu0 %vm234_vm0, %v208_v0  ;;  %v205_v3 = vld [vmem:[%s1162_s1 + $0x8] sm:$0xff]  ;;  %v204_v4 = vld [vmem:[%s1162_s1] sm:$0xff]  ;;  %vm209_vm1 = vcmask 302080   ;;  %v282_v8 = vld [vmem:[%s1163_s2 + $0x18] sm:$0xff]  ;;  %vm377_vm2 = vcmask 523264  }
  0x15   : > { %780 = vmatpush.msk.msra.mxu2 %vm234_vm0, %v208_v0  ;;  %s777_s10 = sshll.u32 %s192_s7, 6  ;;  %v283_v6 = vld [vmem:[%s1163_s2 + $0x20] sm:$0x1f]  ;;  %v281_v9 = vld [vmem:[%s1163_s2 + $0x10] sm:$0xff]  ;;  %v280_v10 = vld [vmem:[%s1163_s2 + $0x8] sm:$0xff] }
  0x16   : > { %781 = vmatpush.msra.mxu1 %v207_v1  ;;  %250 = vmatpush.msra.mxu0 %v207_v1  ;;  %s1007_s13 = scalar_lea.vmem %s1161_s0, %s777_s10  ;;  %v279_v12 = vld [vmem:[%s1163_s2] sm:$0xff]  ;;  %v331_v25 = vld [vmem:[%s1164_s3 + $0x18] sm:$0xff]  ;;  %v330_v27 = vld [vmem:[%s1164_s3 + $0x10] sm:$0xff]  ;;  %s651_s10 = sshll.u32 %s648_s8, 4  ;;  %s652_s10 = int_to_ptr.hbm [resolvable:$true] %s651_s10 }
  0x17   : > { %782 = vmatpush.msra.mxu2 %v207_v1  ;;  %v1013_v5 = vld [vmem:[%s1007_s13 + $0x18] sm:$0xff]  ;;  %v196_v7 = vld [vmem:[%s1007_s13] sm:$0xff]  ;;  %v197_v13 = vld [vmem:[%s1007_s13 + $0x8] sm:$0xff]  ;;  %s862_s12 = sshra.s32 %s652_s10, 4  ;;  %s863_s12 = int_to_ptr.hbm [resolvable:$true] %s862_s12 }
  0x18   : > { %783 = vmatpush.msra.mxu1 %v206_v2  ;;  %251 = vmatpush.msra.mxu0 %v206_v2  ;;  %v200_v11 = vld [vmem:[%s1007_s13 + $0x20] sm:$0xff]  ;;  %v198_v14 = vld [vmem:[%s1007_s13 + $0x10] sm:$0xff]  ;;  %v201_v15 = vld [vmem:[%s1007_s13 + $0x28] sm:$0xff]  ;;  %p869_p0 = scmp.lt.s32.totalorder %s863_s12, %s1165_s4 }
  0x19   : > { %784 = vmatpush.msra.mxu2 %v206_v2  ;;  %v202_v16 = vld [vmem:[%s1007_s13 + $0x30] sm:$0xff]  ;;  %v203_v17 = vld [vmem:[%s1007_s13 + $0x38] sm:$0xff]  ;;  %v332_v24 = vld [vmem:[%s1164_s3 + $0x20] sm:$0x1f]  ;;  %s864_s13 = scalar_lea.hbm %s863_s12, 64 }
  0x1a   : > { %785 = vmatpush.msra.mxu1 %v205_v3  ;;  %252 = vmatpush.msra.mxu0 %v205_v3  ;;  %v329_v28 = vld [vmem:[%s1164_s3 + $0x8] sm:$0xff]  ;;  %v328_v29 = vld [vmem:[%s1164_s3] sm:$0xff]  ;;  %p865_p11 = scmp.ne.s32.totalorder %s863_s12, %s864_s13  ;;  %p870_p1 = scmp.lt.s32.totalorder %s868_s20, %s864_s13 }
  0x1b   : > { %786 = vmatpush.msra.mxu2 %v205_v3 }
  0x1c   : > { %787 = vmatpush.msra.mxu1 %v204_v4  ;;  %253 = vmatpush.msra.mxu0 %v204_v4  ;;  %p866_p12 = pnand %p865_p11, %p977_p5  ;;  %p871_p2 = por %p870_p1, %p869_p0 }
  0x1d   : > { %725 = vmatmul.msk.f32.vlgmr.msra.gmra.mxu1 %vm209_vm1, %v1013_v5  ;;  %722 = vmatmul.msk.f32.vlgmr.msra.gmra.mxu0 %vm209_vm1, %v196_v7 }
  0x1e   : > { %730 = vmatpush.msk.msrb.mxu1 %vm234_vm0, %v283_v6  ;;  %788 = vmatpush.msra.mxu2 %v204_v4  ;;  %p867_p13 = pneg %p866_p12 }
  0x1f   : > { %727 = vmatmul.msk.f32.vlgmr.msra.gmra.mxu2 %vm209_vm1, %v201_v15 }
  0x20   : > { %299 = vmatpush.msrb.mxu1 %v282_v8  ;;  %739 = vmatpush.msk.msrb.mxu2 %vm234_vm0, %v332_v24  ;;  %p872_p3 = pnand %p871_p2, %p867_p13 }
  0x22   : > { %300 = vmatpush.msrb.mxu1 %v281_v9  ;;  %348 = vmatpush.msrb.mxu2 %v331_v25 }
  0x24   : > { %301 = vmatpush.msrb.mxu1 %v280_v10  ;;  %349 = vmatpush.msrb.mxu2 %v330_v27 }
  0x25   : > { %726 = vmatmul.msk.f32.gmra.mxu1 %vm209_vm1, %v200_v11  ;;  %723 = vmatmul.msk.f32.gmra.mxu0 %vm209_vm1, %v197_v13 }
  0x26   : > { %302 = vmatpush.msrb.mxu1 %v279_v12  ;;  %350 = vmatpush.msrb.mxu2 %v329_v28 }
  0x27   : > { %728 = vmatmul.msk.f32.gmra.mxu2 %vm209_vm1, %v202_v16 }
  0x28   : > { %351 = vmatpush.msrb.mxu2 %v328_v29 }
  0x2d   : > { %731 = vmatmul.msk.f32.vlgmr.msrb.gmra.mxu1 %vm209_vm1, %v196_v7  ;;  %724 = vmatmul.msk.f32.gmra.mxu0 %vm209_vm1, %v198_v14 }
  0x2f   : > { %729 = vmatmul.msk.f32.gmra.mxu2 %vm209_vm1, %v203_v17 }
  0x35   : > { %732 = vmatmul.msk.f32.gmra.mxu1 %vm209_vm1, %v197_v13 }
  0x37   : > { %740 = vmatmul.msk.f32.vlgmr.msrb.gmra.mxu2 %vm209_vm1, %v196_v7 }
  0x3d   : > { %733 = vmatmul.msk.f32.gmra.mxu1 %vm209_vm1, %v198_v14 }
  0x3f   : > { %741 = vmatmul.msk.f32.gmra.mxu2 %vm209_vm1, %v197_v13 }
  0x45   : > { %734 = vmatmul.msk.f32.gmra.mxu1 %vm209_vm1, %v1013_v5 }
  0x47   : > { %742 = vmatmul.msk.f32.gmra.mxu2 %vm209_vm1, %v198_v14 }
  0x4d   : > { %735 = vmatmul.msk.f32.gmra.mxu1 %vm209_vm1, %v200_v11 }
  0x4f   : > { %743 = vmatmul.msk.f32.gmra.mxu2 %vm209_vm1, %v1013_v5 }
  0x55   : > { %736 = vmatmul.msk.f32.gmra.mxu1 %vm209_vm1, %v201_v15 }
  0x57   : > { %744 = vmatmul.msk.f32.gmra.mxu2 %vm209_vm1, %v200_v11 }
  0x5d   : > { %737 = vmatmul.msk.f32.gmra.mxu1 %vm209_vm1, %v202_v16 }
  0x5f   : > { %745 = vmatmul.msk.f32.gmra.mxu2 %vm209_vm1, %v201_v15 }
  0x65   : > { %738 = vmatmul.msk.f32.gmra.mxu1 %vm209_vm1, %v203_v17 }
  0x67   : > { %746 = vmatmul.msk.f32.gmra.mxu2 %vm209_vm1, %v202_v16 }
  0x6f   : > { %747 = vmatmul.msk.f32.gmra.mxu2 %vm209_vm1, %v203_v17 }
  0x9a   : > { %v264_v18 = vpop.f32.mrf.mxu1  ;;  %v255_v33 = vpop.f32.mrf.mxu0 }
  0xa2   : > { %v267_v19 = vpop.f32.mrf.mxu1  ;;  %v258_v34 = vpop.f32.mrf.mxu0 }
  0xa3   : > { %v270_v36 = vpop.f32.mrf.mxu2 }
  0xaa   : > { %v304_v20 = vpop.f32.mrf.mxu1  ;;  %v261_v35 = vpop.f32.mrf.mxu0 }
  0xab   : > { %v273_v37 = vpop.f32.mrf.mxu2 }
  0xb2   : > { %v307_v21 = vpop.f32.mrf.mxu1 }
  0xb3   : > { %v276_v38 = vpop.f32.mrf.mxu2 }
  0xba   : > { %v310_v22 = vpop.f32.mrf.mxu1 }
  0xbb   : > { %v353_v39 = vpop.f32.mrf.mxu2 }
  0xc2   : > { %v313_v23 = vpop.f32.mrf.mxu1 }
  0xc3   : > { %v356_v40 = vpop.f32.mrf.mxu2 }
  0xca   : > { %v316_v26 = vpop.f32.mrf.mxu1 }
  0xcb   : > { %v359_v41 = vpop.f32.mrf.mxu2 }
  0xd2   : > { %v319_v30 = vpop.f32.mrf.mxu1 }
  0xd3   : > { %v362_v42 = vpop.f32.mrf.mxu2 }
  0xda   : > { %v322_v31 = vpop.f32.mrf.mxu1 }
  0xdb   : > { %v365_v43 = vpop.f32.mrf.mxu2 }
  0xe2   : > { %v325_v32 = vpop.f32.mrf.mxu1 }
  0xe3   : > { %748 = vmatpush.xpose.msk.msra.mxu3 %vm377_vm2, %v325_v32  ;;  %v368_v44 = vpop.f32.mrf.mxu2 }
  0xe7   : > { %749 = vmatpush.xpose.msk.msra.mxu3 %vm377_vm2, %v322_v31 }
  0xeb   : > { %750 = vmatpush.xpose.msk.msra.mxu3 %vm377_vm2, %v319_v30  ;;  %v371_v45 = vpop.f32.mrf.mxu2 }
  0xef   : > { %751 = vmatpush.xpose.msk.msra.mxu3 %vm377_vm2, %v316_v26 }
  0xf3   : > { %752 = vmatpush.xpose.msk.msra.mxu3 %vm377_vm2, %v313_v23  ;;  %v374_v47 = vpop.f32.mrf.mxu2 }
  0xf4   : > { %595 = vmatpush.msrb.mxu0 %v374_v47 }
  0xf6   : > { %596 = vmatpush.msrb.mxu0 %v371_v45 }
  0xf7   : > { %753 = vmatpush.xpose.msk.msra.mxu3 %vm377_vm2, %v310_v22 }
  0xf8   : > { %597 = vmatpush.msrb.mxu0 %v368_v44 }
  0xfa   : > { %598 = vmatpush.msrb.mxu0 %v365_v43 }
  0xfb   : > { %754 = vmatpush.xpose.msk.msra.mxu3 %vm377_vm2, %v307_v21 }
  0xfc   : > { %599 = vmatpush.msrb.mxu0 %v362_v42 }
  0xfe   : > { %600 = vmatpush.msrb.mxu0 %v359_v41 }
  0xff   : > { %755 = vmatpush.xpose.msk.msra.mxu3 %vm377_vm2, %v304_v20 }
 0x100   : > { %601 = vmatpush.msrb.mxu0 %v356_v40 }
 0x102   : > { %756 = vmatmul.msk.f32.vlgmr.msra.gmra.mxu3 %vm377_vm2, %v255_v33  ;;  %602 = vmatpush.msrb.mxu0 %v353_v39 }
 0x10a   : > { %757 = vmatmul.msk.f32.gmra.mxu3 %vm377_vm2, %v258_v34 }
 0x112   : > { %758 = vmatmul.msk.f32.gmra.mxu3 %vm377_vm2, %v261_v35 }
 0x11a   : > { %759 = vmatmul.msk.f32.gmra.mxu3 %vm377_vm2, %v264_v18 }
 0x122   : > { %760 = vmatmul.msk.f32.gmra.mxu3 %vm377_vm2, %v267_v19 }
 0x12a   : > { %761 = vmatmul.msk.f32.gmra.mxu3 %vm377_vm2, %v270_v36 }
 0x132   : > { %762 = vmatmul.msk.f32.gmra.mxu3 %vm377_vm2, %v273_v37 }
 0x13a   : > { %763 = vmatmul.msk.f32.gmra.mxu3 %vm377_vm2, %v276_v38 }
 0x185   : > { %v443_v46 = vpop.f32.mrf.mxu3 }
 0x186   : > { %v467_v58 = vmul.f32 0.125, %v443_v46 }
 0x188   : > { %v475_v4 = vsel %vm377_vm2, %v467_v58, -inf }
 0x18d   : > { %v446_v48 = vpop.f32.mrf.mxu3 }
 0x18e   : > { %v468_v55 = vmul.f32 0.125, %v446_v48 }
 0x190   : > { %v476_v63 = vsel %vm377_vm2, %v468_v55, -inf }
 0x195   : > { %v449_v49 = vpop.f32.mrf.mxu3 }
 0x196   : > { %v469_v59 = vmul.f32 0.125, %v449_v49 }
 0x198   : > { %v477_v5 = vsel %vm377_vm2, %v469_v59, -inf }
 0x19d   : > { %v452_v50 = vpop.f32.mrf.mxu3 }
 0x19e   : > { %v470_v60 = vmul.f32 0.125, %v452_v50 }
 0x1a0   : > { %v478_v6 = vsel %vm377_vm2, %v470_v60, -inf }
 0x1a5   : > { %v455_v51 = vpop.f32.mrf.mxu3 }
 0x1a6   : > { %v471_v56 = vmul.f32 0.125, %v455_v51 }
 0x1a8   : > { %v479_v0 = vsel %vm377_vm2, %v471_v56, -inf }
 0x1a9   : > { %v480_v8 = vmax.f32 %v475_v4, %v479_v0 }
 0x1ad   : > { %v458_v52 = vpop.f32.mrf.mxu3 }
 0x1ae   : > { %v472_v54 = vmul.f32 0.125, %v458_v52 }
 0x1b0   : > { %v481_v61 = vsel %vm377_vm2, %v472_v54, -inf }
 0x1b1   : > { %v482_v3 = vmax.f32 %v476_v63, %v481_v61 }
 0x1b3   : > { %v487_v11 = vmax.f32 %v480_v8, %v482_v3 }
 0x1b5   : > { %v461_v53 = vpop.f32.mrf.mxu3 }
 0x1b6   : > { %v473_v57 = vmul.f32 0.125, %v461_v53 }
 0x1b8   : > { %v483_v1 = vsel %vm377_vm2, %v473_v57, -inf }
 0x1b9   : > { %v484_v9 = vmax.f32 %v477_v5, %v483_v1 }
 0x1bd   : > { %v464_v62 = vpop.f32.mrf.mxu3 }
 0x1be   : > { %v474_v2 = vmul.f32 0.125, %v464_v62 }
 0x1c0   : > { %v485_v7 = vsel %vm377_vm2, %v474_v2, -inf }
 0x1c1   : > { %v486_v10 = vmax.f32 %v478_v6, %v485_v7 }
 0x1c3   : > { %v488_v12 = vmax.f32 %v484_v9, %v486_v10 }
 0x1c5   : > { %v489_v13 = vmax.f32 %v487_v11, %v488_v12 }
 0x1c7   : > { %v490_v14 = vrot.slane %v489_v13, 4 }
 0x1c9   : > { %v491_v15 = vmax.f32 %v489_v13, %v490_v14 }
 0x1cb   : > { %v492_v16 = vrot.slane %v491_v15, 2 }
 0x1cd   : > { %v493_v17 = vmax.f32 %v491_v15, %v492_v16 }
 0x1cf   : > { %v494_v18 = vrot.slane %v493_v17, 1 }
 0x1d1   : > { %v495_v19 = vmax.f32 %v493_v17, %v494_v18 }
 0x1d3   : > { %v496_v20 = vsub.f32 %v467_v58, %v495_v19  ;;  %v497_v21 = vsub.f32 %v468_v55, %v495_v19  ;;  %v498_v22 = vsub.f32 %v469_v59, %v495_v19  ;;  %v499_v23 = vsub.f32 %v470_v60, %v495_v19 }
 0x1d4   : > { %v500_v24 = vsub.f32 %v471_v56, %v495_v19  ;;  %v501_v28 = vsub.f32 %v472_v54, %v495_v19  ;;  %v502_v30 = vsub.f32 %v473_v57, %v495_v19  ;;  %v503_v32 = vsub.f32 %v474_v2, %v495_v19 }
 0x1d5   : > { %v504_v25 = vmul.f32 1.442695, %v496_v20  ;;  %v506_v26 = vmul.f32 1.442695, %v497_v21  ;;  %v508_v27 = vmul.f32 1.442695, %v498_v22 }
 0x1d6   : > { %v510_v29 = vmul.f32 1.442695, %v499_v23  ;;  %v512_v31 = vmul.f32 1.442695, %v500_v24  ;;  %v514_v33 = vmul.f32 1.442695, %v501_v28 }
 0x1d7   : > { %830 = vpow2.f32 %v504_v25  ;;  %v516_v34 = vmul.f32 1.442695, %v502_v30  ;;  %v518_v37 = vmul.f32 1.442695, %v503_v32 }
 0x1d8   : > { %832 = vpow2.f32 %v506_v26 }
 0x1d9   : > { %834 = vpow2.f32 %v508_v27 }
 0x1da   : > { %836 = vpow2.f32 %v510_v29 }
 0x1db   : > { %838 = vpow2.f32 %v512_v31 }
 0x1dc   : > { %840 = vpow2.f32 %v514_v33 }
 0x1dd   : > { %v831_v35 = vpop.eup %830  ;;  %842 = vpow2.f32 %v516_v34 }
 0x1de   : > { %v833_v36 = vpop.eup %832  ;;  %v520_v38 = vsel %vm377_vm2, %v831_v35, 0.0  ;;  %844 = vpow2.f32 %v518_v37 }
 0x1df   : > { %v835_v39 = vpop.eup %834  ;;  %v521_v40 = vsel %vm377_vm2, %v833_v36, 0.0 }
 0x1e0   : > { %v837_v41 = vpop.eup %836  ;;  %v522_v42 = vadd.f32 %v521_v40, %v520_v38  ;;  %v523_v43 = vsel %vm377_vm2, %v835_v39, 0.0 }
 0x1e1   : > { %v839_v44 = vpop.eup %838  ;;  %v525_v46 = vsel %vm377_vm2, %v837_v41, 0.0 }
 0x1e2   : > { %v524_v45 = vadd.f32 %v523_v43, %v522_v42  ;;  %v841_v47 = vpop.eup %840  ;;  %v527_v49 = vsel %vm377_vm2, %v839_v44, 0.0 }
 0x1e3   : > { %v843_v50 = vpop.eup %842  ;;  %v529_v52 = vsel %vm377_vm2, %v841_v47, 0.0 }
 0x1e4   : > { %v526_v48 = vadd.f32 %v525_v46, %v524_v45  ;;  %v845_v53 = vpop.eup %844  ;;  %v531_v55 = vsel %vm377_vm2, %v843_v50, 0.0 }
 0x1e5   : > { %v533_v57 = vsel %vm377_vm2, %v845_v53, 0.0 }
 0x1e6   : > { %v528_v51 = vadd.f32 %v527_v49, %v526_v48 }
 0x1e8   : > { %v530_v54 = vadd.f32 %v529_v52, %v528_v51 }
 0x1ea   : > { %v532_v56 = vadd.f32 %v531_v55, %v530_v54 }
 0x1ec   : > { %v534_v58 = vadd.f32 %v533_v57, %v532_v56 }
 0x1ee   : > { %v535_v59 = vrot.slane %v534_v58, 4 }
 0x1f0   : > { %v536_v60 = vadd.f32 %v535_v59, %v534_v58 }
 0x1f2   : > { %v537_v61 = vrot.slane %v536_v60, 2 }
 0x1f4   : > { %v538_v62 = vadd.f32 %v537_v61, %v536_v60 }
 0x1f6   : > { %v539_v63 = vrot.slane %v538_v62, 1 }
 0x1f8   : > { %v540_v0 = vadd.f32 %v539_v63, %v538_v62 }
 0x1fa   : > { %846 = vrcp.f32 %v540_v0  ;;  %v552_v4 = vand.u32 2147483648, %v540_v0  ;;  %v550_v6 = vand.u32 2147483647, %v540_v0  ;;  %vm546_vm4 = vweird.f32 %v540_v0 }
 0x1fc   : > { %v553_v8 = vor.u32 1.1754944e-38, %v552_v4  ;;  %vm551_vm6 = vcmp.eq.f32.partialorder %v550_v6, 8.507059e+37 }
 0x200   : > { %v847_v1 = vpop.eup %846 }
 0x201   : > { %v542_v2 = vmul.f32 %v847_v1, %v540_v0  ;;  %vm547_vm3 = vweird.f32 %v847_v1 }
 0x202   : > { %vm548_vm5 = vmor %vm546_vm4, %vm547_vm3 }
 0x203   : > { %v543_v3 = vsub.f32 1.0, %v542_v2 }
 0x205   : > { %v544_v5 = vmul.f32 %v847_v1, %v543_v3 }
 0x207   : > { %v545_v7 = vadd.f32 %v847_v1, %v544_v5 }
 0x209   : > { %v549_v9 = vsel %vm548_vm5, %v847_v1, %v545_v7 }
 0x20a   : > { %v554_v10 = vsel %vm551_vm6, %v553_v8, %v549_v9 }
 0x20b   : > { %v555_v11 = vmul.f32 %v831_v35, %v554_v10  ;;  %v556_v12 = vmul.f32 %v833_v36, %v554_v10  ;;  %v557_v13 = vmul.f32 %v835_v39, %v554_v10  ;;  %v558_v14 = vmul.f32 %v837_v41, %v554_v10 }
 0x20c   : > { %v559_v15 = vmul.f32 %v839_v44, %v554_v10  ;;  %v560_v16 = vmul.f32 %v841_v47, %v554_v10  ;;  %v561_v17 = vmul.f32 %v843_v50, %v554_v10  ;;  %v562_v18 = vmul.f32 %v845_v53, %v554_v10 }
 0x20d   : > { %764 = vmatmul.msk.f32.vlgmr.msrb.gmra.mxu0 %vm377_vm2, %v555_v11 }
 0x215   : > { %765 = vmatmul.msk.f32.gmra.mxu0 %vm377_vm2, %v556_v12 }
 0x21d   : > { %766 = vmatmul.msk.f32.gmra.mxu0 %vm377_vm2, %v557_v13 }
 0x225   : > { %767 = vmatmul.msk.f32.gmra.mxu0 %vm377_vm2, %v558_v14 }
 0x22d   : > { %768 = vmatmul.msk.f32.gmra.mxu0 %vm377_vm2, %v559_v15 }
 0x235   : > { %769 = vmatmul.msk.f32.gmra.mxu0 %vm377_vm2, %v560_v16 }
 0x23d   : > { %770 = vmatmul.msk.f32.gmra.mxu0 %vm377_vm2, %v561_v17 }
 0x245   : > { %771 = vmatmul.msk.f32.gmra.mxu0 %vm377_vm2, %v562_v18 }
 0x28a   : > { %v604_v19 = vpop.f32.mrf.mxu0 }
 0x28b   : > { %628 = vst.msk [vmem:[%s190_s30] sm:$0xff] %vm377_vm2, %v604_v19 }
 0x292   : > { %v607_v20 = vpop.f32.mrf.mxu0 }
 0x293   : > { %629 = vst.msk [vmem:[%s190_s30 + $0x8] sm:$0xff] %vm377_vm2, %v607_v20 }
 0x29a   : > { %v610_v21 = vpop.f32.mrf.mxu0 }
 0x29b   : > { %630 = vst.msk [vmem:[%s190_s30 + $0x10] sm:$0xff] %vm377_vm2, %v610_v21 }
 0x2a2   : > { %v613_v22 = vpop.f32.mrf.mxu0 }
 0x2a3   : > { %631 = vst.msk [vmem:[%s190_s30 + $0x18] sm:$0xff] %vm377_vm2, %v613_v22 }
 0x2aa   : > { %v616_v23 = vpop.f32.mrf.mxu0 }
 0x2ab   : > { %632 = vst.msk [vmem:[%s190_s30 + $0x20] sm:$0xff] %vm377_vm2, %v616_v23 }
 0x2b2   : > { %v619_v24 = vpop.f32.mrf.mxu0 }
 0x2b3   : > { %633 = vst.msk [vmem:[%s190_s30 + $0x28] sm:$0xff] %vm377_vm2, %v619_v24 }
 0x2ba   : > { %v622_v25 = vpop.f32.mrf.mxu0 }
 0x2bb   : > { %634 = vst.msk [vmem:[%s190_s30 + $0x30] sm:$0xff] %vm377_vm2, %v622_v25 }
 0x2c2   : > { %v625_v26 = vpop.f32.mrf.mxu0 }
 0x2c3   : > { %635 = vst.msk [vmem:[%s190_s30 + $0x38] sm:$0xff] %vm377_vm2, %v625_v26 }
 0x2c4   : > { %875 = shalt.err (!%p872_p3)
}
 0x2c5   : > { %s912_s27 = smov 128   ;;  %s913_s28 = smov 8  }
 0x2c6   : > { %789 = dma.vmem_to_hbm [thread:$0]  (%p977_p5), %s650_s9, 1024, %s652_s10, %s637_s11, %s912_s27, %s912_s27, %s913_s28  }
 0x2c7 PF: > { %p795_p4 = scmp.ge.s32.totalorder %s910_s18, 2  ;;  %s666_s29 = sand.u32 1, %s898_s15  }
 0x2c8   : > { %s667_s30 = scalar_lea.sflag [#allocation3], %s666_s29 }
 0x2c9   : > { %p792_p7 = pnand %p795_p4, %p981_p6 }
 0x2cb   : > { %p793_p8 = pneg %p792_p7 }
 0x2cd   : > { %893 = dma.done.wait (%p793_p8), %s667_s30, 1024  }
 0x2ce   : > { %895 = vsyncadd (%p793_p8), %s667_s30, 4294966272  ;;  %p14_p9 = scmp.ge.s32.totalorder %s964_s21, 4   ;;  %s1168_s15 = smov %s902_s16 }
 0x2cf   : > { %s1169_s16 = smov %s906_s17  ;;  %s1170_s17 = smov %s975_s24 }
 0x2d0   : > { %s1171_s18 = smov %s964_s21  ;;  %16 = sbr.rel (!%p14_p9) target bundleno = 3 (0x3), region = 71 }
 0x2d5   :  { %673 = vsyncpa [#allocation3], 1 }
 0x2d6   :  { %675 = vsyncpa [#allocation3 + $0x1], 1 }

</bundles_post_ra>
